<compile_context>
chip_gen: v6e
topology: v6e:2x2x1
jax: 0.10.0
libtpu: 0.0.40
codegen_flags: <defaults>
</compile_context>

<pallas_src>
import functools
import math

import jax
import jax.numpy as jnp
from jax.experimental import pallas as pl
from jax.experimental.pallas import tpu as pltpu

_MIB = 1024 * 1024


# --------------------------------------------------------------------------- #
# Hardware-aware sizing helpers
# --------------------------------------------------------------------------- #
def _vmem_capacity_bytes():
    """Physical VMEM per core; conservative 64 MiB (v7x) if the query fails."""
    try:
        info = pltpu.get_tpu_info()
        cap = int(getattr(info, "vmem_capacity_bytes", 0) or 0)
        if cap > 0:
            return cap
    except Exception:
        pass
    return 64 * _MIB


def _compiler_params(num_grid_axes):
    cap = _vmem_capacity_bytes()
    # Leave headroom for compiler-internal scratch instead of claiming all of VMEM.
    limit = max(32 * _MIB, min(int(cap * 0.75), cap - 8 * _MIB))
    return pltpu.CompilerParams(
        dimension_semantics=("parallel",) * num_grid_axes,
        vmem_limit_bytes=limit,
    )


def _target_block_bytes():
    """Single-buffer byte budget for one (emb + out + pe) block.

    Double-buffering makes the resident footprint ~2x this: ~16 MiB on 64 MiB
    VMEM chips (v7x), ~32 MiB on 128 MiB chips (v5e/v6e).
    """
    cap = _vmem_capacity_bytes()
    return 16 * _MIB if cap >= 100 * _MIB else 8 * _MIB


def _sublane_align(*dtypes):
    """Native sublane tile: 8 for 32-bit, 16 for 16-bit, 32 for 8-bit dtypes."""
    return max(8 * max(1, 4 // max(jnp.dtype(d).itemsize, 1)) for d in dtypes)


# --------------------------------------------------------------------------- #
# Kernel body (shared by all paths)
# --------------------------------------------------------------------------- #
def _pe_add_kernel(emb_ref, pe_ref, out_ref, *, scale):
    # emb stays in its stored dtype until here (bf16-friendly); pe likewise.
    emb = emb_ref[...].astype(jnp.float32)
    pe = pe_ref[...].astype(jnp.float32)
    out_ref[...] = (emb * scale + pe).astype(out_ref.dtype)


# --------------------------------------------------------------------------- #
# PE table (matches the PyTorch __init__, computed in f32)
# --------------------------------------------------------------------------- #
def make_positional_encoding_table(dim, max_len=400, dtype=jnp.float32):
    """pe of shape (1, max_len, dim). dtype=bf16 halves PE read bandwidth (v5e)."""
    position = jnp.arange(0, max_len, dtype=jnp.float32)[:, None]
    div_term = jnp.exp(
        jnp.arange(0, dim, 2, dtype=jnp.float32) * -(math.log(10000.0) / dim)
    )
    angles = position * div_term[None, :]
    pe = jnp.zeros((max_len, dim), dtype=jnp.float32)
    pe = pe.at[:, 0::2].set(jnp.sin(angles))
    pe = pe.at[:, 1::2].set(jnp.cos(angles))
    return pe[None, :, :].astype(dtype)


# --------------------------------------------------------------------------- #
# Sequence (encoder) path
# --------------------------------------------------------------------------- #
def _forward_seq_folded(emb, pe_used, scale, out_dtype):
    """S % 8 == 0: (B, S, D) -> (B, G, (S/G)*D) so sublanes are fully packed
    for any batch size; pe block (1, G, tn) broadcasts over the leading axis."""
    B, S, D = emb.shape
    emb_bytes = emb.dtype.itemsize
    out_bytes = jnp.dtype(out_dtype).itemsize
    pe_bytes = pe_used.dtype.itemsize

    G = 16 if (S % 16 == 0 and emb_bytes < 4) else 8  # avoid 16-sublane padding for bf16
    M = (S // G) * D
    emb3 = emb.reshape(B, G, M)
    pe3 = pe_used.reshape(1, G, M)

    budget = _target_block_bytes()

    # Lane tile: multiple of 128, or full extent when M < 128.
    if M <= 128:
        tn = M
    else:
        tn_cap = (M // 128) * 128
        per_lane = B * G * (emb_bytes + out_bytes) + G * pe_bytes
        tn = max(128, min(tn_cap, (budget // per_lane // 128) * 128))
    # Batch tile: shrink only if a full-batch block overshoots the budget.
    per_batch = G * tn * (emb_bytes + out_bytes)
    tb = max(1, min(B, budget // max(per_batch, 1)))

    # Enough grid steps to double-buffer DMAs and feed both v7x TensorCores,
    # but only when the problem is large enough to amortize per-step overhead.
    if B * G * M * out_bytes > 4 * _MIB:
        while pl.cdiv(B, tb) * pl.cdiv(M, tn) < 4:
            if tn > 128:
                tn = max(128, ((tn // 2) // 128) * 128)
            elif tb > 1:
                tb = max(1, tb // 2)
            else:
                break

    grid = (pl.cdiv(B, tb), pl.cdiv(M, tn))
    out3 = pl.pallas_call(
        functools.partial(_pe_add_kernel, scale=scale),
        out_shape=jax.ShapeDtypeStruct((B, G, M), out_dtype),
        grid_spec=pltpu.PrefetchScalarGridSpec(
            num_scalar_prefetch=0,
            grid=grid,
            in_specs=[
                pl.BlockSpec((tb, G, tn), lambda b, n: (b, 0, n)),   # activations
                pl.BlockSpec((1, G, tn), lambda b, n: (0, 0, n)),    # PE, shared over batch
            ],
            out_specs=pl.BlockSpec((tb, G, tn), lambda b, n: (b, 0, n)),
        ),
        compiler_params=_compiler_params(2),
    )(emb3, pe3)
    return out3.reshape(B, S, D)


def _forward_seq_flat(emb, pe_used, scale, out_dtype):
    """Fallback (S % 8 != 0): lane-dense (B, S*D) layout with a cdiv lane grid."""
    B, S, D = emb.shape
    N = S * D
    emb2 = emb.reshape(B, N)
    pe2 = pe_used.reshape(1, N)

    emb_bytes = emb.dtype.itemsize
    out_bytes = jnp.dtype(out_dtype).itemsize
    pe_bytes = pe_used.dtype.itemsize
    budget = _target_block_bytes()
    row_align = _sublane_align(emb.dtype, out_dtype)

    tb = B if B <= row_align else min((B // row_align) * row_align, 256)
    if N <= 128:
        tn = N
    else:
        # Budget includes the 8-sublane VMEM padding of the (1, tn) pe block.
        per_lane = tb * (emb_bytes + out_bytes) + 8 * pe_bytes
        tn = max(128, min((N // 128) * 128, (budget // per_lane // 128) * 128))

    if B * N * out_bytes > 4 * _MIB:
        while pl.cdiv(B, tb) * pl.cdiv(N, tn) < 4:
            if tn > 128:
                tn = max(128, ((tn // 2) // 128) * 128)
            elif tb > row_align:
                tb = max(row_align, ((tb // 2) // row_align) * row_align)
            else:
                break

    grid = (pl.cdiv(B, tb), pl.cdiv(N, tn))
    out2 = pl.pallas_call(
        functools.partial(_pe_add_kernel, scale=scale),
        out_shape=jax.ShapeDtypeStruct((B, N), out_dtype),
        grid_spec=pltpu.PrefetchScalarGridSpec(
            num_scalar_prefetch=0,
            grid=grid,
            in_specs=[
                pl.BlockSpec((tb, tn), lambda b, n: (b, n)),
                pl.BlockSpec((1, tn), lambda b, n: (0, n)),
            ],
            out_specs=pl.BlockSpec((tb, tn), lambda b, n: (b, n)),
        ),
        compiler_params=_compiler_params(2),
    )(emb2, pe2)
    return out2.reshape(B, S, D)


# --------------------------------------------------------------------------- #
# Decoder-step path
# --------------------------------------------------------------------------- #
def _forward_step(emb, pe_row, scale, out_dtype):
    """out = emb * scale + pe[:, step][:, None, :] (decode; typically S == 1)."""
    B, S, D = emb.shape
    R = B * S

    # Pack k rows per lane row so the output's last dim reaches 128 lanes
    # (unmasked vst) when the head dim is narrow.
    k = 1
    if D < 128 and 128 % D == 0:
        k = 128 // D
        while k > 1 and R % k != 0:
            k //= 2
    rows, lanes = R // k, k * D

    emb2 = emb.reshape(rows, lanes)
    pe2 = jnp.tile(pe_row.reshape(1, D), (1, k))  # (1, k*D) <= 128 elems, tiny

    emb_bytes = emb.dtype.itemsize
    out_bytes = jnp.dtype(out_dtype).itemsize
    budget = _target_block_bytes()
    row_align = _sublane_align(emb.dtype, out_dtype)

    if rows <= row_align:
        tr = rows
    else:
        per_row = lanes * (emb_bytes + out_bytes)
        tr = max(row_align, min((rows // row_align) * row_align,
                                (budget // max(per_row, 1) // row_align) * row_align))

    grid = (pl.cdiv(rows, tr),)
    out2 = pl.pallas_call(
        functools.partial(_pe_add_kernel, scale=scale),
        out_shape=jax.ShapeDtypeStruct((rows, lanes), out_dtype),
        grid_spec=pltpu.PrefetchScalarGridSpec(
            num_scalar_prefetch=0,
            grid=grid,
            in_specs=[
                pl.BlockSpec((tr, lanes), lambda r: (r, 0)),   # activation rows
                pl.BlockSpec((1, lanes), lambda r: (0, 0)),    # single PE row, resident
            ],
            out_specs=pl.BlockSpec((tr, lanes), lambda r: (r, 0)),
        ),
        compiler_params=_compiler_params(1),
    )(emb2, pe2)
    return out2.reshape(B, S, D)


# --------------------------------------------------------------------------- #
# Public forward
# --------------------------------------------------------------------------- #
def positional_encoding_forward(emb, pe, dim, step=None, dropout_p=0.0,
                                out_dtype=jnp.float32):
    """emb: (B, S, D). Returns emb*sqrt(dim) + PE via Pallas TPU kernels.

    `step` follows PyTorch truthiness: step=None or step=0 takes the sequence
    path (adds pe[:, :S]); a nonzero int takes the decode path.
    `out_dtype=jnp.bfloat16` halves write traffic when downstream allows it.
    """
    scale = math.sqrt(dim)
    del dropout_p  # eval-mode dropout is identity (see TODO at top)
    B, S, D = emb.shape
    if step:
        pe_row = jax.lax.dynamic_slice_in_dim(pe, step, 1, axis=1)[0, 0]  # (D,)
        return _forward_step(emb, pe_row, scale, out_dtype)
    pe_used = pe[0, :S, :]  # (S, D), kept in its stored dtype (f32 or bf16)
    if S % 8 == 0:
        return _forward_seq_folded(emb, pe_used, scale, out_dtype)
    return _forward_seq_flat(emb, pe_used, scale, out_dtype)


# --------------------------------------------------------------------------- #
# Demo / self-test
# --------------------------------------------------------------------------- #
if __name__ == "__main__":
    key = jax.random.PRNGKey(0)
    batch, seq, dim = 2, 8, 32
    max_len = 400
    dropout_p = 0.1

    pe = make_positional_encoding_table(dim, max_len=max_len)

    # --- Sequence (encoder) path, S % 8 == 0 -> sublane-folded layout. ---
    emb = jax.random.normal(key, (batch, seq, dim), dtype=jnp.float32)
    out = jax.block_until_ready(
        positional_encoding_forward(emb, pe, dim, step=None, dropout_p=dropout_p))
    ref = emb * math.sqrt(dim) + pe[:, :seq, :]
    assert out.shape == (batch, seq, dim) and out.dtype == jnp.float32
    assert jnp.allclose(out, ref, atol=1e-5), "mismatch vs reference (seq folded path)"

    # --- Sequence path, S % 8 != 0 (ragged cdiv lane grid) with native bf16 emb. ---
    emb_odd = jax.random.normal(jax.random.PRNGKey(2), (2, 5, dim), dtype=jnp.bfloat16)
    out_odd = jax.block_until_ready(
        positional_encoding_forward(emb_odd, pe, dim, step=None, dropout_p=dropout_p))
    ref_odd = emb_odd.astype(jnp.float32) * math.sqrt(dim) + pe[:, :5, :]
    assert jnp.allclose(out_odd, ref_odd, atol=1e-5), "mismatch vs reference (seq flat path)"

    # --- Decoder-step path (step > 0, mirroring PyTorch `if step:`). ---
    step = 5
    emb_step = jax.random.normal(jax.random.PRNGKey(1), (batch, 1, dim), dtype=jnp.float32)
    out_s = jax.block_until_ready(
        positional_encoding_forward(emb_step, pe, dim, step=step, dropout_p=dropout_p))
    ref_s = emb_step * math.sqrt(dim) + pe[:, step][:, None, :]
    assert jnp.allclose(out_s, ref_s, atol=1e-5), "mismatch vs reference (step path)"

    print("KERNEL_OK")
</pallas_src>

<mosaic_0001>
module attributes {stable_mosaic.version = 11 : i64} {
  func.func @_pe_add_kernel(%arg0: i32, %arg1: i32, %arg2: memref<2x8x32xf32, #tpu.memory_space<vmem>>, %arg3: memref<1x8x32xf32, #tpu.memory_space<vmem>>, %arg4: memref<2x8x32xf32, #tpu.memory_space<vmem>>) attributes {dimension_semantics = [#tpu.dimension_semantics<parallel>, #tpu.dimension_semantics<parallel>], iteration_bounds = array<i64: 1, 1>, scalar_prefetch = 0 : i64, scratch_operands = 0 : i64, tpu.core_type = #tpu.core_type<tc>, window_params = [{transform_indices = @transform_0, window_bounds = array<i64: 2, 8, 32>}, {transform_indices = @transform_1, window_bounds = array<i64: 1, 8, 32>}, {transform_indices = @transform_2, window_bounds = array<i64: 2, 8, 32>}]} {
    %c0 = arith.constant 0 : index
    %c0_0 = arith.constant 0 : index
    %c0_1 = arith.constant 0 : index
    %0 = vector.load %arg2[%c0, %c0_0, %c0_1] : memref<2x8x32xf32, #tpu.memory_space<vmem>>, vector<2x8x32xf32>
    %c0_2 = arith.constant 0 : index
    %c0_3 = arith.constant 0 : index
    %c0_4 = arith.constant 0 : index
    %1 = vector.load %arg3[%c0_2, %c0_3, %c0_4] : memref<1x8x32xf32, #tpu.memory_space<vmem>>, vector<1x8x32xf32>
    %cst = arith.constant 5.65685415 : f32
    %2 = vector.broadcast %cst : f32 to vector<2x8x32xf32>
    %3 = arith.mulf %0, %2 : vector<2x8x32xf32>
    %4 = vector.broadcast %1 : vector<1x8x32xf32> to vector<2x8x32xf32>
    %5 = arith.addf %3, %4 : vector<2x8x32xf32>
    %c0_5 = arith.constant 0 : index
    %c0_6 = arith.constant 0 : index
    %c0_7 = arith.constant 0 : index
    %6 = vector.load %arg4[%c0_5, %c0_6, %c0_7] : memref<2x8x32xf32, #tpu.memory_space<vmem>>, vector<2x8x32xf32>
    tpu.vector_store %arg4[%c0_5, %c0_6, %c0_7], %5 {strides = array<i32>} : memref<2x8x32xf32, #tpu.memory_space<vmem>>, vector<2x8x32xf32>,
    return
  }
  func.func @transform_0(%arg0: i32, %arg1: i32) -> (i32, i32, i32) {
    %c0_i32 = arith.constant 0 : i32
    %c0_i32_0 = arith.constant 0 : i32
    return %arg0, %c0_i32, %arg1 : i32, i32, i32
  }
  func.func @transform_1(%arg0: i32, %arg1: i32) -> (i32, i32, i32) {
    %c0_i32 = arith.constant 0 : i32
    %c0_i32_0 = arith.constant 0 : i32
    %c0_i32_1 = arith.constant 0 : i32
    return %c0_i32, %c0_i32_0, %arg1 : i32, i32, i32
  }
  func.func @transform_2(%arg0: i32, %arg1: i32) -> (i32, i32, i32) {
    %c0_i32 = arith.constant 0 : i32
    %c0_i32_0 = arith.constant 0 : i32
    return %arg0, %c0_i32, %arg1 : i32, i32, i32
  }
}

</mosaic_0001>

<bundles_post_ra>
// kernel: tpu_custom_call.1
= control target key start
LH: loop header
LB: loop body
LE: loop exit
PB: predicated region body
PF: predicated region fallthrough
CT: control target
= control target key end

     0   :  { %7 = vsyncpa [#allocation3], 0  ;;  %s172_s0 = inlined_call_operand.hbm [shape: f32[2,8,32], index: 0, kind: input, shape index: {}]   ;;  %s173_s1 = inlined_call_operand.hbm [shape: f32[1,8,32], index: 1, kind: input, shape index: {}]   ;;  %s174_s2 = inlined_call_operand.hbm [shape: f32[2,8,32], index: 2, kind: output, shape index: {}]  }
   0x1   :  { %8 = vsyncpa [#allocation6], 0 }
   0x2   :  { %9 = vsyncpa [#allocation4], 0  ;;  %s137_s9 = smov [#allocation2]  }
   0x3   :  { %s15_s10 = sshll.u32 %s137_s9, 4  ;;  %s16_s10 = int_to_ptr.vmem [resolvable:$true] %s15_s10 }
   0x4   :  { %s79_s11 = scalar_lea.vmem %s16_s10, 256  ;;  %p84_p1 = scmp.lt.s32.totalorder %s16_s10, %s16_s10 }
   0x5   :  { %p80_p0 = scmp.ne.s32.totalorder %s16_s10, %s79_s11  ;;  %p85_p2 = scmp.lt.s32.totalorder %s79_s11, %s79_s11 }
   0x7   :  { %p86_p3 = por %p85_p2, %p84_p1 }
   0x9   :  { %p87_p4 = pnand %p86_p3, %p80_p0 }
   0xb   :  { %90 = shalt.err (!%p87_p4)
}
   0xc   :  { %s138_s12 = smov 128   ;;  %s139_s13 = smov 8  }
   0xd   :  { %21 = dma.hbm_to_vmem [thread:$0]  %s172_s0, 256, %s16_s10, [#allocation3], %s138_s12, %s138_s12, %s139_s13  }
   0xe   :  { %s140_s16 = smov [#allocation5]  }
   0xf   :  { %s28_s17 = sshll.u32 %s140_s16, 4  ;;  %s29_s17 = int_to_ptr.vmem [resolvable:$true] %s28_s17 }
  0x10   :  { %s99_s18 = scalar_lea.vmem %s29_s17, 128  ;;  %p104_p6 = scmp.lt.s32.totalorder %s29_s17, %s29_s17 }
  0x11   :  { %p100_p5 = scmp.ne.s32.totalorder %s29_s17, %s99_s18  ;;  %p105_p7 = scmp.lt.s32.totalorder %s99_s18, %s99_s18 }
  0x13   :  { %p106_p8 = por %p105_p7, %p104_p6 }
  0x15   :  { %p107_p9 = pnand %p106_p8, %p100_p5 }
  0x17   :  { %110 = shalt.err (!%p107_p9)
}
  0x18   :  { %31 = dma.hbm_to_vmem [thread:$0]  %s173_s1, 128, %s29_s17, [#allocation6]  }
  0x19   :  { %131 = dma.done.wait [#allocation3], 256  }
  0x1a   :  { %132 = vsyncadd [#allocation3], 4294967040 }
  0x1b   :  { %133 = dma.done.wait [#allocation6], 128  }
  0x1c   :  { %134 = vsyncadd [#allocation6], 4294967168  ;;  %v38_v0 = vld [vmem:[#allocation2] sm:$0xff]  ;;  %v40_v1 = vld [vmem:[#allocation5] sm:$0xff]  ;;  %s141_s0 = smov [#allocation7]   ;;  %vm45_vm0 = vcmask 261120  }
  0x1d   :  { %v39_v2 = vld [vmem:[#allocation2 + $0x8] sm:$0xff]  ;;  %s53_s21 = sshll.u32 %s141_s0, 4  ;;  %v41_v3 = vmul.f32 5.656854, %v38_v0  ;;  %s54_s21 = int_to_ptr.vmem [resolvable:$true] %s53_s21 }
  0x1e   :  { %v42_v4 = vmul.f32 5.656854, %v39_v2  ;;  %s111_s22 = scalar_lea.vmem %s54_s21, 256  ;;  %p116_p11 = scmp.lt.s32.totalorder %s54_s21, %s54_s21 }
  0x1f   :  { %v43_v5 = vadd.f32 %v41_v3, %v40_v1  ;;  %p112_p10 = scmp.ne.s32.totalorder %s54_s21, %s111_s22  ;;  %p117_p12 = scmp.lt.s32.totalorder %s111_s22, %s111_s22 }
  0x20   :  { %v44_v6 = vadd.f32 %v42_v4, %v40_v1 }
  0x21   :  { %46 = vst.msk [vmem:[#allocation7] sm:$0xff] %vm45_vm0, %v43_v5  ;;  %p118_p13 = por %p117_p12, %p116_p11 }
  0x22   :  { %47 = vst.msk [vmem:[#allocation7 + $0x8] sm:$0xff] %vm45_vm0, %v44_v6 }
  0x23   :  { %p119_p0 = pnand %p118_p13, %p112_p10 }
  0x25   :  { %122 = shalt.err (!%p119_p0)
}
  0x26   :  { %59 = dma.vmem_to_hbm [thread:$0]  %s54_s21, 256, %s174_s2, [#allocation4], %s138_s12, %s138_s12, %s139_s13  }
  0x27   :  { %135 = dma.done.wait [#allocation4], 256  }
  0x28   :  { %136 = vsyncadd [#allocation4], 4294967040 }
  0x29   :  { %63 = vsyncpa [#allocation3], 1 }
  0x2a   :  { %64 = vsyncpa [#allocation6], 1 }
  0x2b   :  { %65 = vsyncpa [#allocation4], 1 }

</bundles_post_ra>
